<compile_context>
chip_gen: v7x
topology: tpu7x:2x2x1
jax: 0.10.0
libtpu: 0.0.40
codegen_flags: <defaults>
</compile_context>

<pallas_src>
import math

import jax
import jax.numpy as jnp
from jax.experimental import pallas as pl
from jax.experimental.pallas import tpu as pltpu


def _round_up(x, m):
    return ((x + m - 1) // m) * m


def critic_kernel(state_ref, action_ref, w1s_ref, w1a_ref, b1_ref, w2t_ref,
                  b2_ref, out_ref):
    # ---- fc1 + ReLU on the VPU: K = obs+act is tiny, unrolled at trace time.
    obs = state_ref.shape[1]
    act = action_ref.shape[1]
    h = b1_ref[...]                                              # (1, H) f32
    for k in range(obs):                                         # static unroll
        h = h + state_ref[:, k:k + 1] * w1s_ref[k:k + 1, :]      # (TB, H)
    for k in range(act):
        h = h + action_ref[:, k:k + 1] * w1a_ref[k:k + 1, :]
    h = jnp.maximum(h, 0.0)                                      # (TB, H)

    # ---- fc2: VPU multiply + one XLU cross-lane reduce (w2 pre-transposed to
    # (1, H)); b2 is an SMEM scalar added on the VPU.
    q = jnp.sum(h * w2t_ref[...], axis=-1, keepdims=True) + b2_ref[0]
    out_ref[...] = q.astype(out_ref.dtype)                       # (TB, 1)


def critic_forward(state, action, w1, b1, w2, b2, *, block_b=512):
    """state=(B,obs), action=(B,act), w1=(obs+act,H), b1=(1,H), w2=(H,1), b2=(1,1)."""
    B, obs = state.shape
    act = action.shape[1]
    H = w1.shape[1]

    # Kernel-friendly weight layout (tiny one-time slices/reshapes outside kernel).
    w1s = w1[:obs]                   # (obs, H)
    w1a = w1[obs:]                   # (act, H)
    w2t = jnp.reshape(w2, (1, H))    # lane-dense (1, H) instead of (H, 1)
    b2s = jnp.reshape(b2, (1,))      # scalar -> SMEM

    # Row-tiled batch grid: TB multiple of 8 (sublane), pad B up to TB multiple.
    TB = _round_up(min(block_b, _round_up(B, 8)), 8)
    Bp = _round_up(B, TB)
    if Bp != B:
        pad = Bp - B
        state = jnp.pad(state, ((0, pad), (0, 0)))
        action = jnp.pad(action, ((0, pad), (0, 0)))

    q = pl.pallas_call(
        critic_kernel,
        out_shape=jax.ShapeDtypeStruct((Bp, 1), jnp.float32),
        grid=(Bp // TB,),
        in_specs=[
            pl.BlockSpec((TB, obs), lambda i: (i, 0)),            # state rows
            pl.BlockSpec((TB, act), lambda i: (i, 0)),            # action rows
            pl.BlockSpec((obs, H), lambda i: (0, 0)),             # w1_s (resident)
            pl.BlockSpec((act, H), lambda i: (0, 0)),             # w1_a (resident)
            pl.BlockSpec((1, H), lambda i: (0, 0)),               # b1 (resident)
            pl.BlockSpec((1, H), lambda i: (0, 0)),               # w2^T (resident)
            pl.BlockSpec(memory_space=pltpu.MemorySpace.SMEM),    # b2 scalar
        ],
        out_specs=pl.BlockSpec((TB, 1), lambda i: (i, 0)),
        compiler_params=pltpu.CompilerParams(
            dimension_semantics=("parallel",)),
    )(state, action, w1s, w1a, b1, w2t, b2s)
    return q[:B]


def init_critic_params(key, obs_size, action_size, hidden=128):
    """Deterministic init mimicking torch.nn.Linear default U(-1/sqrt(fan_in), .)."""
    k1, k2, k3, k4 = jax.random.split(key, 4)
    in1 = obs_size + action_size
    bound1 = 1.0 / math.sqrt(in1)
    bound2 = 1.0 / math.sqrt(hidden)
    w1 = jax.random.uniform(k1, (in1, hidden), jnp.float32, -bound1, bound1)
    b1 = jax.random.uniform(k2, (1, hidden), jnp.float32, -bound1, bound1)
    w2 = jax.random.uniform(k3, (hidden, 1), jnp.float32, -bound2, bound2)
    b2 = jax.random.uniform(k4, (1, 1), jnp.float32, -bound2, bound2)
    return w1, b1, w2, b2


def critic_ref(state, action, w1, b1, w2, b2):
    """Pure-JAX reference (full f32 precision) for correctness check."""
    x = jnp.concatenate([state, action], axis=1)
    h = jnp.maximum(
        jnp.dot(x, w1, precision=jax.lax.Precision.HIGHEST) + b1, 0.0)
    return jnp.dot(h, w2, precision=jax.lax.Precision.HIGHEST) + b2


if __name__ == "__main__":
    # MountainCarContinuous-v0: obs_size=2, action_size=1
    obs_size, action_size = 2, 1

    key = jax.random.PRNGKey(0)
    kp, ks, ka = jax.random.split(key, 3)
    w1, b1, w2, b2 = init_critic_params(kp, obs_size, action_size)

    # Case 1: batch not a multiple of 8, small tile -> multi-step grid
    # (exercises padding, row tiling and the parallel grid axis).
    B1 = 20
    state1 = jax.random.normal(ks, (B1, obs_size), jnp.float32)
    action1 = jax.random.normal(ka, (B1, action_size), jnp.float32)
    q1 = jax.block_until_ready(
        critic_forward(state1, action1, w1, b1, w2, b2, block_b=8))
    q1_ref = critic_ref(state1, action1, w1, b1, w2, b2)
    assert q1.shape == (B1, 1)
    assert jnp.allclose(q1, q1_ref, atol=1e-5, rtol=1e-5), "mismatch (tiled)"

    # Case 2: tiny batch, single-tile path with default tile size.
    B2 = 8
    state2 = state1[:B2]
    action2 = action1[:B2]
    q2 = jax.block_until_ready(critic_forward(state2, action2, w1, b1, w2, b2))
    q2_ref = critic_ref(state2, action2, w1, b1, w2, b2)
    assert q2.shape == (B2, 1)
    assert jnp.allclose(q2, q2_ref, atol=1e-5, rtol=1e-5), "mismatch (single)"

    print("KERNEL_OK")
</pallas_src>

<mosaic_0001>
module attributes {stable_mosaic.version = 11 : i64} {
  func.func @critic_kernel(%arg0: i32, %arg1: memref<8x2xf32, #tpu.memory_space<vmem>>, %arg2: memref<8x1xf32, #tpu.memory_space<vmem>>, %arg3: memref<2x128xf32, #tpu.memory_space<vmem>>, %arg4: memref<1x128xf32, #tpu.memory_space<vmem>>, %arg5: memref<1x128xf32, #tpu.memory_space<vmem>>, %arg6: memref<1x128xf32, #tpu.memory_space<vmem>>, %arg7: memref<1xf32, #tpu.memory_space<smem>>, %arg8: memref<8x1xf32, #tpu.memory_space<vmem>>) attributes {dimension_semantics = [#tpu.dimension_semantics<parallel>], iteration_bounds = array<i64: 3>, scalar_prefetch = 0 : i64, scratch_operands = 0 : i64, tpu.core_type = #tpu.core_type<tc>, window_params = [{transform_indices = @transform_0, window_bounds = array<i64: 8, 2>}, {transform_indices = @transform_1, window_bounds = array<i64: 8, 1>}, {pipeline_mode = #tpu.pipeline_mode<synchronous>, transform_indices = @transform_2, window_bounds = array<i64: 2, 128>}, {pipeline_mode = #tpu.pipeline_mode<synchronous>, transform_indices = @transform_3, window_bounds = array<i64: 1, 128>}, {pipeline_mode = #tpu.pipeline_mode<synchronous>, transform_indices = @transform_4, window_bounds = array<i64: 1, 128>}, {pipeline_mode = #tpu.pipeline_mode<synchronous>, transform_indices = @transform_5, window_bounds = array<i64: 1, 128>}, {transform_indices = @transform_6, window_bounds = array<i64: 1>}, {transform_indices = @transform_7, window_bounds = array<i64: 8, 1>}]} {
    %c0 = arith.constant 0 : index
    %c0_0 = arith.constant 0 : index
    %0 = vector.load %arg5[%c0, %c0_0] : memref<1x128xf32, #tpu.memory_space<vmem>>, vector<1x128xf32>
    %c0_1 = arith.constant 0 : index
    %c0_2 = arith.constant 0 : index
    %1 = vector.load %arg1[%c0_1, %c0_2] : memref<8x2xf32, #tpu.memory_space<vmem>>, vector<8x1xf32>
    %c0_3 = arith.constant 0 : index
    %c0_4 = arith.constant 0 : index
    %2 = vector.load %arg3[%c0_3, %c0_4] : memref<2x128xf32, #tpu.memory_space<vmem>>, vector<1x128xf32>
    %3 = vector.broadcast %1 : vector<8x1xf32> to vector<8x128xf32>
    %4 = vector.broadcast %2 : vector<1x128xf32> to vector<8x128xf32>
    %5 = arith.mulf %3, %4 : vector<8x128xf32>
    %6 = vector.broadcast %0 : vector<1x128xf32> to vector<8x128xf32>
    %7 = arith.addf %6, %5 : vector<8x128xf32>
    %c0_5 = arith.constant 0 : index
    %c1 = arith.constant 1 : index
    %8 = vector.load %arg1[%c0_5, %c1] : memref<8x2xf32, #tpu.memory_space<vmem>>, vector<8x1xf32>
    %c1_6 = arith.constant 1 : index
    %c0_7 = arith.constant 0 : index
    %9 = vector.load %arg3[%c1_6, %c0_7] : memref<2x128xf32, #tpu.memory_space<vmem>>, vector<1x128xf32>
    %10 = vector.broadcast %8 : vector<8x1xf32> to vector<8x128xf32>
    %11 = vector.broadcast %9 : vector<1x128xf32> to vector<8x128xf32>
    %12 = arith.mulf %10, %11 : vector<8x128xf32>
    %13 = arith.addf %7, %12 : vector<8x128xf32>
    %c0_8 = arith.constant 0 : index
    %c0_9 = arith.constant 0 : index
    %14 = vector.load %arg2[%c0_8, %c0_9] : memref<8x1xf32, #tpu.memory_space<vmem>>, vector<8x1xf32>
    %c0_10 = arith.constant 0 : index
    %c0_11 = arith.constant 0 : index
    %15 = vector.load %arg4[%c0_10, %c0_11] : memref<1x128xf32, #tpu.memory_space<vmem>>, vector<1x128xf32>
    %16 = vector.broadcast %14 : vector<8x1xf32> to vector<8x128xf32>
    %17 = vector.broadcast %15 : vector<1x128xf32> to vector<8x128xf32>
    %18 = arith.mulf %16, %17 : vector<8x128xf32>
    %19 = arith.addf %13, %18 : vector<8x128xf32>
    %cst = arith.constant 0.000000e+00 : f32
    %20 = vector.broadcast %cst : f32 to vector<8x128xf32>
    %21 = arith.maximumf %19, %20 : vector<8x128xf32>
    %c0_12 = arith.constant 0 : index
    %c0_13 = arith.constant 0 : index
    %22 = vector.load %arg6[%c0_12, %c0_13] : memref<1x128xf32, #tpu.memory_space<vmem>>, vector<1x128xf32>
    %23 = vector.broadcast %22 : vector<1x128xf32> to vector<8x128xf32>
    %24 = arith.mulf %21, %23 : vector<8x128xf32>
    %cst_14 = arith.constant dense<0.000000e+00> : vector<8xf32>
    %25 = vector.multi_reduction <add>, %24, %cst_14 [1] : vector<8x128xf32> to vector<8xf32>
    %26 = vector.shape_cast %25 : vector<8xf32> to vector<8x1xf32>
    %c0_15 = arith.constant 0 : index
    %27 = memref.load %arg7[%c0_15] : memref<1xf32, #tpu.memory_space<smem>>
    %28 = vector.broadcast %27 : f32 to vector<8x1xf32>
    %29 = arith.addf %26, %28 : vector<8x1xf32>
    %c0_16 = arith.constant 0 : index
    %c0_17 = arith.constant 0 : index
    %30 = vector.load %arg8[%c0_16, %c0_17] : memref<8x1xf32, #tpu.memory_space<vmem>>, vector<8x1xf32>
    tpu.vector_store %arg8[%c0_16, %c0_17], %29 {strides = array<i32>} : memref<8x1xf32, #tpu.memory_space<vmem>>, vector<8x1xf32>,
    return
  }
  func.func @transform_0(%arg0: i32) -> (i32, i32) {
    %c0_i32 = arith.constant 0 : i32
    %c0_i32_0 = arith.constant 0 : i32
    return %arg0, %c0_i32 : i32, i32
  }
  func.func @transform_1(%arg0: i32) -> (i32, i32) {
    %c0_i32 = arith.constant 0 : i32
    %c0_i32_0 = arith.constant 0 : i32
    return %arg0, %c0_i32 : i32, i32
  }
  func.func @transform_2(%arg0: i32) -> (i32, i32) {
    %c0_i32 = arith.constant 0 : i32
    %c0_i32_0 = arith.constant 0 : i32
    %c0_i32_1 = arith.constant 0 : i32
    return %c0_i32, %c0_i32_0 : i32, i32
  }
  func.func @transform_3(%arg0: i32) -> (i32, i32) {
    %c0_i32 = arith.constant 0 : i32
    %c0_i32_0 = arith.constant 0 : i32
    %c0_i32_1 = arith.constant 0 : i32
    return %c0_i32, %c0_i32_0 : i32, i32
  }
  func.func @transform_4(%arg0: i32) -> (i32, i32) {
    %c0_i32 = arith.constant 0 : i32
    %c0_i32_0 = arith.constant 0 : i32
    %c0_i32_1 = arith.constant 0 : i32
    return %c0_i32, %c0_i32_0 : i32, i32
  }
  func.func @transform_5(%arg0: i32) -> (i32, i32) {
    %c0_i32 = arith.constant 0 : i32
    %c0_i32_0 = arith.constant 0 : i32
    %c0_i32_1 = arith.constant 0 : i32
    return %c0_i32, %c0_i32_0 : i32, i32
  }
  func.func @transform_6(%arg0: i32) -> i32 {
    %c0_i32 = arith.constant 0 : i32
    %c0_i32_0 = arith.constant 0 : i32
    return %c0_i32 : i32
  }
  func.func @transform_7(%arg0: i32) -> (i32, i32) {
    %c0_i32 = arith.constant 0 : i32
    %c0_i32_0 = arith.constant 0 : i32
    return %arg0, %c0_i32 : i32, i32
  }
}

</mosaic_0001>

<bundles_post_ra>
// kernel: tpu_custom_call.1
= control target key start
LH: loop header
LB: loop body
LE: loop exit
PB: predicated region body
PF: predicated region fallthrough
CT: control target
= control target key end

     0   :  { %s501_s26 = smov 0   ;;  %s541_s0 = inlined_call_operand.vmem [shape: f32[24,2], index: 0, kind: input, shape index: {}]   ;;  %s542_s1 = inlined_call_operand.vmem [shape: f32[24,1], index: 1, kind: input, shape index: {}]   ;;  %s543_s2 = inlined_call_operand.vmem [shape: f32[2,128], index: 2, kind: input, shape index: {}]   ;;  %s544_s3 = inlined_call_operand.vmem [shape: f32[1,128], index: 3, kind: input, shape index: {}]   ;;  %s545_s4 = inlined_call_operand.vmem [shape: f32[1,128], index: 4, kind: input, shape index: {}]   ;;  %s546_s5 = inlined_call_operand.vmem [shape: f32[1,128], index: 5, kind: input, shape index: {}]   ;;  %s547_s6 = inlined_call_operand.<no memory space> [shape: f32[1], index: 6, kind: input, shape index: {}]   ;;  %s548_s7 = inlined_call_operand.vmem [shape: f32[24,1], index: 7, kind: output, shape index: {}]  }
   0x1   :  { %12 = sst [smem:[#allocation2]] %s547_s6 }
   0x2 LB: > { %s419_s27 = sadd.s32 4294967295, %s454_s26   ;;  %p423_p0 = scmp.ge.s32.totalorder %s454_s26, 1  ;;  %s454_s26 = sphi %s501_s26, %s18_s26  }
   0x3   : > { %p246_p1 = scmp.lt.s32.totalorder %s454_s26, 4 }
   0x5   : > { %p247_p2 = pnand %p423_p0, %p246_p1 }
   0x6   : > { %p280_p3 = scmp.lt.s32.totalorder (!%p247_p2), %s419_s27, 2  ;;  %v456_v0 = vmov (!%p247_p2), 0   ;;  %v457_v3 = vmov (!%p247_p2), 1   ;;  %v427_v4 = vld [vmem:[%s543_s2] ss:$0 sm:$0xff] (!%p247_p2)  ;;  %s349_s21 = sld [smem:[#allocation2]] (!%p247_p2) }
   0x7   : > { %250 = sbr.rel (%p247_p2) target bundleno = 306 (0x132), region = 48  ;;  %444 = vset.pattern.permute.xlu0 (!%p247_p2), %v456_v0  ;;  %446 = vset.pattern.permute.xlu1 (!%p247_p2), %v456_v0  ;;  %v428_v7 = vld [vmem:[%s545_s4] ss:$0 sm:$0xff] (!%p247_p2)  ;;  %v429_v8 = vld [vmem:[%s543_s2 + $0x1] ss:$0 sm:$0xff] (!%p247_p2)  ;;  %vm352_vm0 = vcmask (!%p247_p2), 7168  }
   0x8   : > { %v430_v9 = vld [vmem:[%s544_s3] ss:$0 sm:$0xff] (!%p247_p2) }
   0x9   : > { %v431_v17 = vld [vmem:[%s546_s5] ss:$0 sm:$0xff] (!%p247_p2) }
   0xc   : > { %v350_v20 = vstv (!%p247_p2), %s349_s21 }
   0xe   : > { %s550_s27 = smov (!%p280_p3, %s419_s27), 2 }
   0xf   : > { %s509_s6 = sshll.u32 %s550_s27, 3 }
  0x10   : > { %s283_s30 = scalar_lea.vmem %s541_s0, %s509_s6  ;;  %s287_s10 = scalar_lea.vmem %s542_s1, %s509_s6 }
  0x11   : > { %v293_v1 = vld [vmem:[%s283_s30] sm:$0xff]  ;;  %s291_s24 = scalar_lea.vmem %s548_s7, %s509_s6 }
  0x12   : > { %297 = vperm.xlu0 %444, %v293_v1   ;;  %v323_v2 = vld [vmem:[%s287_s10] sm:$0xff] }
  0x13   : > { %327 = vperm.xlu1 %446, %v323_v2  }
  0x16   : > { %445 = vset.pattern.permute.xlu0 %v457_v3 }
  0x17   : > { %314 = vperm.xlu0 %445, %v293_v1  }
  0x1b   : > { %447 = vset.pattern.permute.xlu0 %v456_v0 }
  0x91   : > { %v298_v5 = vpop.permute.xlu0 %297 }
  0x92   : > { %v304_v6 = vmul.f32 %v427_v4, %v298_v5  ;;  %v328_v10 = vpop.permute.xlu1 %327 }
  0x93   : > { %v336_v14 = vmul.f32 %v430_v9, %v328_v10 }
  0x94   : > { %v311_v12 = vadd.f32 %v428_v7, %v304_v6 }
  0x96   : > { %v315_v11 = vpop.permute.xlu0 %314 }
  0x97   : > { %v321_v13 = vmul.f32 %v429_v8, %v315_v11 }
  0x99   : > { %v322_v15 = vadd.f32 %v321_v13, %v311_v12 }
  0x9b   : > { %v337_v16 = vadd.f32 %v336_v14, %v322_v15 }
  0x9d   : > { %v338_v18 = vmax.f32 %v337_v16, 0.0 }
  0x9f   : > { %v346_v19 = vmul.f32 %v431_v17, %v338_v18 }
  0xa1   : > { %347 = vadd.xlane.f32.xlu1 %v346_v19 }
 0x12e   : > { %v348_v21 = vpop.xlane.xlu1 %347 }
 0x12f   : > { %v351_v22 = vadd.f32 %v350_v20, %v348_v21 }
 0x131   : > { %353 = vst.msk [vmem:[%s291_s24] sm:$0xff] %vm352_vm0, %v351_v22 }
 0x132 PF: > { %s18_s26 = sadd.s32 1, %s454_s26  }
 0x133   : > { %p15_p4 = scmp.ge.s32.totalorder %s18_s26, 5  }
 0x135   :  { %17 = sbr.rel (!%p15_p4) target bundleno = 2 (0x2), region = 81 }

</bundles_post_ra>
